<compile_context>
chip_gen: v5e
topology: v5e:2x2
jax: 0.10.0
libtpu: 0.0.40
codegen_flags: <defaults>
</compile_context>

<pallas_src>
import numpy as np
import jax
import jax.numpy as jnp
from jax.experimental import pallas as pl
from jax.experimental.pallas import tpu as pltpu


# ----------------------------------------------------------------------------
# Pallas kernel: fused identity-branch matmul + pyramid contribution + bias + ReLU
# ----------------------------------------------------------------------------
def _psp_bottleneck_kernel(x_ref, l_ref, s_ref, w_ref, b_ref, o_ref):
    # x_ref: (TM, Cp)   bf16  identity-branch pixels (NHWC flattened over H*W)
    # l_ref: (TM, K2p)  bf16  bilinear upsample weights for all pyramid cells
    # s_ref: (K2p, Np)  bf16  per-image pooled * (stage_w^T @ W_bneck_slice)
    # w_ref: (Cp, Np)   bf16  bottleneck weight slice for the identity branch
    # b_ref: (1, Np)    f32   bottleneck bias
    # o_ref: (TM, Np)   bf16  output (f32 accumulate, bf16 store)
    acc = jnp.dot(x_ref[...], w_ref[...], preferred_element_type=jnp.float32)
    acc = acc + jnp.dot(l_ref[...], s_ref[...], preferred_element_type=jnp.float32)
    acc = acc + b_ref[...]
    o_ref[...] = jnp.maximum(acc, 0.0).astype(o_ref.dtype)


# ----------------------------------------------------------------------------
# Static helpers: adaptive average pool / bilinear upsample as small matrices
# ----------------------------------------------------------------------------
def adaptive_pool_matrix(in_size, out_size):
    # rows average the adaptive-pool bins (PyTorch AdaptiveAvgPool2d semantics)
    m = np.zeros((out_size, in_size), dtype=np.float32)
    for i in range(out_size):
        start = (i * in_size) // out_size
        end = -(-((i + 1) * in_size) // out_size)  # ceil
        m[i, start:end] = 1.0 / (end - start)
    return m


def upsample_matrix(src, dst):
    # bilinear, align_corners=True (matches F.interpolate in the module)
    u = np.zeros((dst, src), dtype=np.float32)
    if src == 1:
        u[:, 0] = 1.0
        return u
    if dst == 1:
        u[0, 0] = 1.0
        return u
    for i in range(dst):
        x = i * (src - 1) / (dst - 1)
        x0 = int(np.floor(x))
        x1 = min(x0 + 1, src - 1)
        w1 = x - x0
        u[i, x0] += 1.0 - w1
        u[i, x1] += w1
    return u


def _round_up(x, m):
    return ((x + m - 1) // m) * m


def _choose_tile(HW, N, tile_m):
    """Pick a row tile tm (multiple of 128 when possible) that divides HW so
    HWp == HW (no post-kernel slice copy), then make sure there are >= 2
    parallel grid units for v7x's two TensorCores."""
    cap = min(tile_m, HW)
    tm = None
    t = (cap // 128) * 128
    while t >= 128:
        if HW % t == 0:
            tm = t
            break
        t -= 128
    if tm is None:                              # no multiple-of-128 divisor <= cap
        tm = min(tile_m, _round_up(HW, 128))
        HWp = _round_up(HW, tm)
    else:
        HWp = HW
    while (N * (HWp // tm) < 2 and tm % 2 == 0 and tm // 2 >= 8
           and HWp % (tm // 2) == 0):
        tm //= 2
    return tm, HWp


# ----------------------------------------------------------------------------
# Operand preparation (all tiny tensors; x is read exactly once for pooling)
# ----------------------------------------------------------------------------
def _prepare_operands(x_nhwc, params, sizes, tile_m):
    assert tile_m % 128 == 0 and tile_m >= 128, "tile_m must be a multiple of 128"
    N, H, W, C = x_nhwc.shape
    Wb = params['bottleneck_w']            # (5C, Nout)  (= PyTorch weight^T)
    b = params['bottleneck_b']             # (Nout,)
    Nout = Wb.shape[1]
    nstages = len(sizes)

    # Single bf16 copy of x feeds both pooling and the kernel.
    x_bf = x_nhwc.astype(jnp.bfloat16)

    # Identity branch: feats is concatenated *last* -> last C rows of Wb.
    w_id = Wb[nstages * C:, :]             # (C, Nout)

    # One pass over x for all row-poolings (all stages' row matrices stacked).
    ph_all = np.concatenate([adaptive_pool_matrix(H, s) for s in sizes], axis=0)
    row_pooled = jnp.einsum('ih,nhwc->niwc', jnp.asarray(ph_all), x_bf)  # f32, tiny

    s_blocks = []                          # per-image pooled+fused values
    l_blocks = []                          # static bilinear weight columns
    off = 0
    for k, s in enumerate(sizes):
        pw = jnp.asarray(adaptive_pool_matrix(W, s))                   # (s, W)
        pooled = jnp.einsum('jw,niwc->nijc', pw, row_pooled[:, off:off + s])
        off += s
        # stage 1x1 conv (no bias) and the bottleneck slice commute with the
        # spatial upsample -> fold them into one tiny (C, Nout) weight.
        fused_w = params['stage_w'][k].T @ Wb[k * C:(k + 1) * C, :]    # (C, Nout)
        small = jnp.einsum('nijc,co->nijo', pooled, fused_w)           # (N,s,s,Nout)
        s_blocks.append(small.reshape(N, s * s, Nout))
        uh = upsample_matrix(s, H)         # (H, s)
        uw = upsample_matrix(s, W)         # (W, s)
        l_blocks.append(np.einsum('Hi,Wj->HWij', uh, uw).reshape(H * W, s * s))

    S = jnp.concatenate(s_blocks, axis=1)                   # (N, K2, Nout)
    L = np.concatenate(l_blocks, axis=1)                    # (H*W, K2); K2 = 50
    K2 = L.shape[1]

    # Padding: C and Nout lane-dense (128); K2 only to 64 (full-extent blocks
    # keep the (8,128) rule satisfied); rows padded only if HW has no good tile.
    Cp = _round_up(C, 128)
    K2p = _round_up(K2, 64)
    Np = _round_up(Nout, 128)
    HW = H * W
    tm, HWp = _choose_tile(HW, N, tile_m)

    xp = x_bf.reshape(N, HW, C)
    if HWp != HW or Cp != C:
        xp = jnp.pad(xp, ((0, 0), (0, HWp - HW), (0, Cp - C)))
    Lp = jnp.asarray(np.pad(L, ((0, HWp - HW), (0, K2p - K2))), jnp.bfloat16)
    Sp = jnp.pad(S, ((0, 0), (0, K2p - K2), (0, Np - Nout))).astype(jnp.bfloat16)
    Wp = jnp.pad(w_id, ((0, Cp - C), (0, Np - Nout))).astype(jnp.bfloat16)
    bp = jnp.pad(b.reshape(1, Nout), ((0, 0), (0, Np - Nout))).astype(jnp.float32)

    meta = dict(N=N, H=H, W=W, C=C, Nout=Nout, HW=HW, HWp=HWp,
                Cp=Cp, K2p=K2p, Np=Np, tm=tm)
    return xp, Lp, Sp, Wp, bp, meta


# ----------------------------------------------------------------------------
# PSPModule forward (NHWC core + thin NCHW adapter)
# ----------------------------------------------------------------------------
def psp_forward_nhwc(x_nhwc, params, sizes=(1, 2, 3, 6), tile_m=1024):
    xp, Lp, Sp, Wp, bp, m = _prepare_operands(x_nhwc, params, sizes, tile_m)
    N, HWp, Cp, K2p, Np, tm = m['N'], m['HWp'], m['Cp'], m['K2p'], m['Np'], m['tm']

    out = pl.pallas_call(
        _psp_bottleneck_kernel,
        out_shape=jax.ShapeDtypeStruct((N, HWp, Np), jnp.bfloat16),
        grid_spec=pltpu.PrefetchScalarGridSpec(
            num_scalar_prefetch=0,
            grid=(N, HWp // tm),
            in_specs=[
                pl.BlockSpec((None, tm, Cp), lambda n, i: (n, i, 0)),   # x
                pl.BlockSpec((tm, K2p), lambda n, i: (i, 0)),           # L
                pl.BlockSpec((None, K2p, Np), lambda n, i: (n, 0, 0)),  # S
                pl.BlockSpec((Cp, Np), lambda n, i: (0, 0)),            # W_id
                pl.BlockSpec((1, Np), lambda n, i: (0, 0)),             # bias
            ],
            out_specs=pl.BlockSpec((None, tm, Np), lambda n, i: (n, i, 0)),
        ),
        # Note: pl.Buffered(3) on x/L could hide DMA jitter on v6e; omitted to
        # keep the default (and well-tested) double-buffered pipeline.
        compiler_params=pltpu.CompilerParams(
            dimension_semantics=("parallel", "parallel")),
    )(xp, Lp, Sp, Wp, bp)

    if m['HWp'] != m['HW'] or m['Np'] != m['Nout']:
        out = out[:, :m['HW'], :m['Nout']]      # only when padding was needed
    return out.reshape(m['N'], m['H'], m['W'], m['Nout'])


def psp_module_forward(feats_nchw, params, sizes=(1, 2, 3, 6), tile_m=1024):
    """NCHW adapter (matches the PyTorch interface). Real integrations should
    call psp_forward_nhwc directly and stay NHWC to avoid the transposes."""
    x_nhwc = jnp.transpose(feats_nchw, (0, 2, 3, 1))
    out_nhwc = psp_forward_nhwc(x_nhwc, params, sizes, tile_m)
    return jnp.transpose(out_nhwc, (0, 3, 1, 2))


# ----------------------------------------------------------------------------
# Parameters and pure-JAX references
# ----------------------------------------------------------------------------
def init_params(key, features, out_features, sizes=(1, 2, 3, 6)):
    keys = jax.random.split(key, len(sizes) + 2)
    stage_w = [
        0.1 * jax.random.normal(keys[i], (features, features), jnp.float32)
        for i in range(len(sizes))
    ]
    k_in = features * (len(sizes) + 1)
    bottleneck_w = 0.1 * jax.random.normal(keys[-2], (k_in, out_features),
                                           jnp.float32)
    bottleneck_b = 0.1 * jax.random.normal(keys[-1], (out_features,),
                                           jnp.float32)
    return {
        'stage_w': stage_w,               # each (C_out, C_in) = (C, C), no bias
        'bottleneck_w': bottleneck_w,     # (5C, out_features)  (PyTorch W^T)
        'bottleneck_b': bottleneck_b,     # (out_features,)
    }


def psp_reference_f32(feats, params, sizes):
    """Straightforward f32 PSPModule forward (NCHW), mirrors the PyTorch code."""
    n, c, h, w = feats.shape
    priors = []
    for k, s in enumerate(sizes):
        ph = jnp.asarray(adaptive_pool_matrix(h, s))
        pw = jnp.asarray(adaptive_pool_matrix(w, s))
        pooled = jnp.einsum('ih,nchw,jw->ncij', ph, feats, pw)
        conved = jnp.einsum('oc,ncij->noij', params['stage_w'][k], pooled)
        uh = jnp.asarray(upsample_matrix(s, h))
        uw = jnp.asarray(upsample_matrix(s, w))
        priors.append(jnp.einsum('Hi,ncij,Wj->ncHW', uh, conved, uw))
    priors.append(feats)
    cat = jnp.concatenate(priors, axis=1)
    out = (jnp.einsum('nkhw,ko->nohw', cat, params['bottleneck_w'])
           + params['bottleneck_b'][None, :, None, None])
    return jnp.maximum(out, 0.0)


if __name__ == "__main__":
    key = jax.random.PRNGKey(0)
    k_x, k_p = jax.random.split(key)

    # Fast-SCNN uses PSPModule(128, 128); spatial size kept small for the demo.
    N, C, H, W = 2, 128, 16, 16
    OUT_FEATURES = 128
    SIZES = (1, 2, 3, 6)

    feats = jax.random.normal(k_x, (N, C, H, W), jnp.float32)
    params = init_params(k_p, C, OUT_FEATURES, SIZES)

    fwd = jax.jit(psp_module_forward, static_argnames=("sizes", "tile_m"))
    out = jax.block_until_ready(fwd(feats, params, sizes=SIZES, tile_m=1024))
    assert out.shape == (N, OUT_FEATURES, H, W)
    assert out.dtype == jnp.bfloat16
    out_f32 = out.astype(jnp.float32)

    # 1) strict check: pure-XLA mirror of the exact fused bf16-operand / f32-acc
    #    math the kernel runs (kernel additionally rounds its store to bf16, so
    #    allow one bf16 ulp of relative slack).
    x_nhwc = jnp.transpose(feats, (0, 2, 3, 1))
    xp, Lp, Sp, Wp, bp, m = _prepare_operands(x_nhwc, params, SIZES, 1024)
    acc = jnp.einsum('nmc,co->nmo', xp, Wp, preferred_element_type=jnp.float32)
    acc = acc + jnp.einsum('mk,nko->nmo', Lp, Sp, preferred_element_type=jnp.float32)
    acc = acc + bp[None]
    ref_strict = jnp.maximum(acc, 0.0)[:, :m['HW'], :m['Nout']]
    ref_strict = ref_strict.reshape(N, H, W, OUT_FEATURES).transpose(0, 3, 1, 2)
    assert jnp.allclose(out_f32, ref_strict, rtol=1.0 / 256, atol=1e-2), \
        "kernel != fused bf16 reference"

    # 2) semantic check against the straightforward f32 PSPModule forward
    #    (loose tolerance accounts for bf16 matmul operands + bf16 output store).
    ref = psp_reference_f32(feats, params, SIZES)
    assert float(jnp.max(jnp.abs(out_f32 - ref))) < 2e-1, \
        "kernel deviates from f32 PSP reference"

    print("KERNEL_OK")
</pallas_src>

<mosaic_0001>
module attributes {stable_mosaic.version = 11 : i64} {
  func.func @_psp_bottleneck_kernel(%arg0: i32, %arg1: i32, %arg2: memref<1x256x128xbf16, #tpu.memory_space<vmem>>, %arg3: memref<256x64xbf16, #tpu.memory_space<vmem>>, %arg4: memref<1x64x128xbf16, #tpu.memory_space<vmem>>, %arg5: memref<128x128xbf16, #tpu.memory_space<vmem>>, %arg6: memref<1x128xf32, #tpu.memory_space<vmem>>, %arg7: memref<1x256x128xbf16, #tpu.memory_space<vmem>>) attributes {dimension_semantics = [#tpu.dimension_semantics<parallel>, #tpu.dimension_semantics<parallel>], iteration_bounds = array<i64: 2, 1>, scalar_prefetch = 0 : i64, scratch_operands = 0 : i64, tpu.core_type = #tpu.core_type<tc>, window_params = [{transform_indices = @transform_0, window_bounds = array<i64: 1, 256, 128>}, {transform_indices = @transform_1, window_bounds = array<i64: 256, 64>}, {transform_indices = @transform_2, window_bounds = array<i64: 1, 64, 128>}, {pipeline_mode = #tpu.pipeline_mode<synchronous>, transform_indices = @transform_3, window_bounds = array<i64: 128, 128>}, {pipeline_mode = #tpu.pipeline_mode<synchronous>, transform_indices = @transform_4, window_bounds = array<i64: 1, 128>}, {transform_indices = @transform_5, window_bounds = array<i64: 1, 256, 128>}]} {
    %c0 = arith.constant 0 : index
    %c0_0 = arith.constant 0 : index
    %c0_1 = arith.constant 0 : index
    %0 = vector.load %arg2[%c0, %c0_0, %c0_1] : memref<1x256x128xbf16, #tpu.memory_space<vmem>>, vector<1x256x128xbf16>
    %1 = vector.shape_cast %0 : vector<1x256x128xbf16> to vector<256x128xbf16>
    %c0_2 = arith.constant 0 : index
    %c0_3 = arith.constant 0 : index
    %2 = vector.load %arg5[%c0_2, %c0_3] : memref<128x128xbf16, #tpu.memory_space<vmem>>, vector<128x128xbf16>
    %cst = arith.constant dense<0.000000e+00> : vector<256x128xf32>
    %3 = tpu.matmul %1, %2, %cst {dimension_numbers = #tpu.dot_dimension_numbers<[1], [0], [0], [1], [0, 0, 1, 1], [], []>} : vector<256x128xbf16>, vector<128x128xbf16>, vector<256x128xf32> -> vector<256x128xf32>
    %c0_4 = arith.constant 0 : index
    %c0_5 = arith.constant 0 : index
    %4 = vector.load %arg3[%c0_4, %c0_5] : memref<256x64xbf16, #tpu.memory_space<vmem>>, vector<256x64xbf16>
    %c0_6 = arith.constant 0 : index
    %c0_7 = arith.constant 0 : index
    %c0_8 = arith.constant 0 : index
    %5 = vector.load %arg4[%c0_6, %c0_7, %c0_8] : memref<1x64x128xbf16, #tpu.memory_space<vmem>>, vector<1x64x128xbf16>
    %6 = vector.shape_cast %5 : vector<1x64x128xbf16> to vector<64x128xbf16>
    %cst_9 = arith.constant dense<0.000000e+00> : vector<256x128xf32>
    %7 = tpu.matmul %4, %6, %cst_9 {dimension_numbers = #tpu.dot_dimension_numbers<[1], [0], [0], [1], [0, 0, 1, 1], [], []>} : vector<256x64xbf16>, vector<64x128xbf16>, vector<256x128xf32> -> vector<256x128xf32>
    %8 = arith.addf %3, %7 : vector<256x128xf32>
    %c0_10 = arith.constant 0 : index
    %c0_11 = arith.constant 0 : index
    %9 = vector.load %arg6[%c0_10, %c0_11] : memref<1x128xf32, #tpu.memory_space<vmem>>, vector<1x128xf32>
    %10 = vector.broadcast %9 : vector<1x128xf32> to vector<256x128xf32>
    %11 = arith.addf %8, %10 : vector<256x128xf32>
    %cst_12 = arith.constant 0.000000e+00 : f32
    %12 = vector.broadcast %cst_12 : f32 to vector<256x128xf32>
    %13 = arith.maximumf %11, %12 : vector<256x128xf32>
    %14 = arith.truncf %13 : vector<256x128xf32> to vector<256x128xbf16>
    %c0_13 = arith.constant 0 : index
    %c0_14 = arith.constant 0 : index
    %c0_15 = arith.constant 0 : index
    %15 = vector.load %arg7[%c0_13, %c0_14, %c0_15] : memref<1x256x128xbf16, #tpu.memory_space<vmem>>, vector<1x256x128xbf16>
    %16 = vector.shape_cast %15 : vector<1x256x128xbf16> to vector<256x128xbf16>
    %17 = vector.shape_cast %14 : vector<256x128xbf16> to vector<1x256x128xbf16>
    tpu.vector_store %arg7[%c0_13, %c0_14, %c0_15], %17 {strides = array<i32>} : memref<1x256x128xbf16, #tpu.memory_space<vmem>>, vector<1x256x128xbf16>,
    return
  }
  func.func @transform_0(%arg0: i32, %arg1: i32) -> (i32, i32, i32) {
    %c0_i32 = arith.constant 0 : i32
    %c0_i32_0 = arith.constant 0 : i32
    return %arg0, %arg1, %c0_i32 : i32, i32, i32
  }
  func.func @transform_1(%arg0: i32, %arg1: i32) -> (i32, i32) {
    %c0_i32 = arith.constant 0 : i32
    %c0_i32_0 = arith.constant 0 : i32
    return %arg1, %c0_i32 : i32, i32
  }
  func.func @transform_2(%arg0: i32, %arg1: i32) -> (i32, i32, i32) {
    %c0_i32 = arith.constant 0 : i32
    %c0_i32_0 = arith.constant 0 : i32
    %c0_i32_1 = arith.constant 0 : i32
    return %arg0, %c0_i32, %c0_i32_0 : i32, i32, i32
  }
  func.func @transform_3(%arg0: i32, %arg1: i32) -> (i32, i32) {
    %c0_i32 = arith.constant 0 : i32
    %c0_i32_0 = arith.constant 0 : i32
    %c0_i32_1 = arith.constant 0 : i32
    return %c0_i32, %c0_i32_0 : i32, i32
  }
  func.func @transform_4(%arg0: i32, %arg1: i32) -> (i32, i32) {
    %c0_i32 = arith.constant 0 : i32
    %c0_i32_0 = arith.constant 0 : i32
    %c0_i32_1 = arith.constant 0 : i32
    return %c0_i32, %c0_i32_0 : i32, i32
  }
  func.func @transform_5(%arg0: i32, %arg1: i32) -> (i32, i32, i32) {
    %c0_i32 = arith.constant 0 : i32
    %c0_i32_0 = arith.constant 0 : i32
    return %arg0, %arg1, %c0_i32 : i32, i32, i32
  }
}

</mosaic_0001>

<bundles_post_ra>
// kernel: psp_module_forward.1
= control target key start
LH: loop header
LB: loop body
LE: loop exit
PB: predicated region body
PF: predicated region fallthrough
CT: control target
= control target key end

     0   :  { %10 = vsyncpa [#allocation3], 0  ;;  %s1924_s0 = inlined_call_operand.vmem [shape: bf16[2,256,128], index: 0, kind: input, shape index: {}]   ;;  %s1925_s1 = inlined_call_operand.vmem [shape: bf16[256,64], index: 1, kind: input, shape index: {}]   ;;  %s1926_s2 = inlined_call_operand.vmem [shape: bf16[2,64,128], index: 2, kind: input, shape index: {}]   ;;  %s1927_s3 = inlined_call_operand.vmem [shape: bf16[128,128], index: 3, kind: input, shape index: {}]   ;;  %s1928_s4 = inlined_call_operand.vmem [shape: f32[1,128], index: 4, kind: input, shape index: {}]   ;;  %s1929_s5 = inlined_call_operand.hbm [shape: bf16[2,256,128], index: 5, kind: output, shape index: {}]  }
   0x1   :  { %12 = vsyncpa [#allocation3 + $0x1], 0  ;;  %s1648_s18 = smov 0   ;;  %s1650_s19 = smov 0  }
   0x2   :  { %s1652_s20 = smov 0   ;;  %s1654_s21 = smov 0  }
   0x3   :  { %s1656_s22 = smov 0   ;;  %s1658_s23 = smov 0  }
   0x4 LB: > { %s1116_s24 = sadd.s32 4294967295, %s1614_s23   ;;  %s1117_s25 = sadd.s32 4294967294, %s1614_s23   ;;  %s1614_s23 = sphi %s1658_s23, %s18_s23   ;;  %s1610_s22 = sphi %s1656_s22, %s1936_s22   ;;  %s1606_s21 = sphi %s1654_s21, %s1935_s21   ;;  %s1602_s20 = sphi %s1652_s20, %s1934_s20   ;;  %s1598_s19 = sphi %s1650_s19, %s1933_s19   ;;  %s1594_s18 = sphi %s1648_s18, %s1932_s18  }
   0x5   : > { %s30_s26 = sadd.s32 1, %s1610_s22  ;;  %s161_s27 = sadd.s32 1, %s1602_s20 }
   0x6   : > { %p32_p0 = scmp.ge.s32.totalorder %s30_s26, 2  ;;  %p171_p1 = scmp.ne.s32.totalorder %s1602_s20, %s1598_s19 }
   0x7   : > { %p172_p2 = scmp.eq.s32.totalorder %s1116_s24, 1  ;;  %p177_p3 = scmp.ne.s32.totalorder %s1598_s19, %s1594_s18 }
   0x8   : > { %s1938_s26 = smov (%p32_p0, %s30_s26), 0  ;;  %p178_p5 = scmp.eq.s32.totalorder %s1117_s25, 1 }
   0x9   : > { %p1688_p4 = por %p172_p2, %p171_p1  ;;  %s156_s29 = ssub.s32 %s1610_s22, %s1938_s26 }
   0xa   : > { %p1121_p6 = scmp.ge.s32.totalorder %s1614_s23, 1  ;;  %p159_p7 = scmp.eq.s32.totalorder %s156_s29, 0 }
   0xb   : > { %p1695_p8 = por %p178_p5, %p177_p3  ;;  %p232_p9 = scmp.lt.s32.totalorder %s1614_s23, 3 }
   0xc   : > { %s1701_s6 = scalar_select %p159_p7, %s1602_s20, %s161_s27  }
   0xd   : > { %p233_p10 = pnand %p1121_p6, %p232_p9 }
   0xe   : > { %p275_p11 = scmp.lt.s32.totalorder (!%p233_p10), %s1606_s21, 1  ;;  %s1370_s10 = sshll.u32 (!%p233_p10), %s1606_s21, 7 }
   0xf   : > { %236 = sbr.rel (%p233_p10) target bundleno = 317 (0x13d), region = 40  ;;  %s1006_s14 = scalar_lea.hbm (!%p233_p10), %s1929_s5, %s1370_s10 }
  0x14   : > { %v1349_v0 = vld [vmem:[%s1927_s3 + $0x38] sm:$0xff]  ;;  %v1348_v1 = vld [vmem:[%s1927_s3 + $0x30] sm:$0xff]  ;;  %s1711_s11 = scalar_select %p275_p11, %s1606_s21, 1  ;;  %v1347_v3 = vld [vmem:[%s1927_s3 + $0x28] sm:$0xff]  ;;  %vm489_vm0 = vcmask 523264  }
  0x15   : > { %771 = vmatpush.bf16.msra.mxu1 %v1349_v0  ;;  %1470 = vmatpush.bf16.msra.mxu2 %v1349_v0  ;;  %v1346_v5 = vld [vmem:[%s1927_s3 + $0x20] sm:$0xff]  ;;  %v1345_v7 = vld [vmem:[%s1927_s3 + $0x18] sm:$0xff]  ;;  %v1344_v9 = vld [vmem:[%s1927_s3 + $0x10] sm:$0xff] }
  0x16   : > { %s1325_s12 = sshll.u32 %s1711_s11, 5  ;;  %v1350_v10 = vld [vmem:[%s1925_s1] sm:$0xff]  ;;  %v1359_v11 = vld [vmem:[%s1925_s1 + $0x48] sm:$0xff]  ;;  %s1324_s16 = sshll.u32 %s1711_s11, 7  ;;  %v1360_v17 = vld [vmem:[%s1925_s1 + $0x50] sm:$0xff] }
  0x17   : > { %s294_s15 = scalar_lea.vmem %s1926_s2, %s1325_s12  ;;  %v1343_v12 = vld [vmem:[%s1927_s3 + $0x8] sm:$0xff]  ;;  %s1744_s25 = scalar_lea.vmem %s1924_s0, %s1324_s16  ;;  %v1342_v13 = vld [vmem:[%s1927_s3] sm:$0xff]  ;;  %v1352_v20 = vld [vmem:[%s1925_s1 + $0x10] sm:$0xff] }
  0x18   : > { %v1369_v2 = vld [vmem:[%s294_s15 + $0x18] sm:$0xff]  ;;  %v1368_v4 = vld [vmem:[%s294_s15 + $0x10] sm:$0xff]  ;;  %v1367_v6 = vld [vmem:[%s294_s15 + $0x8] sm:$0xff]  ;;  %s1556_s11 = scalar_lea.hbm %s1929_s5, 256 }
  0x19   : > { %772 = vmatpush.bf16.msra.mxu1 %v1348_v1  ;;  %1471 = vmatpush.bf16.msra.mxu2 %v1348_v1  ;;  %v1366_v8 = vld [vmem:[%s294_s15] sm:$0xff]  ;;  %v1351_v16 = vld [vmem:[%s1925_s1 + $0x8] sm:$0xff]  ;;  %v1361_v21 = vld [vmem:[%s1925_s1 + $0x58] sm:$0xff]  ;;  %s1009_s15 = sshll.u32 %s1006_s14, 4  ;;  %s1010_s15 = int_to_ptr.hbm [resolvable:$true] %s1009_s15 }
  0x1a   : > { %542 = vmatpush.bf16.msra.mxu0 %v1369_v2  ;;  %1466 = vmatpush.bf16.msra.mxu3 %v1369_v2  ;;  %v1326_v14 = vld [vmem:[%s1744_s25] sm:$0xff]  ;;  %v1327_v18 = vld [vmem:[%s1744_s25 + $0x8] sm:$0xff]  ;;  %v1328_v22 = vld [vmem:[%s1744_s25 + $0x10] sm:$0xff]  ;;  %s1550_s17 = sshra.s32 %s1010_s15, 4  ;;  %s1551_s17 = int_to_ptr.hbm [resolvable:$true] %s1550_s17 }
  0x1b   : > { %v1334_v15 = vld [vmem:[%s1744_s25 + $0x40] sm:$0xff]  ;;  %v1335_v19 = vld [vmem:[%s1744_s25 + $0x48] sm:$0xff]  ;;  %v1336_v23 = vld [vmem:[%s1744_s25 + $0x50] sm:$0xff]  ;;  %s1552_s24 = scalar_lea.hbm %s1551_s17, 128  ;;  %p1557_p1 = scmp.lt.s32.totalorder %s1551_s17, %s1929_s5 }
  0x1c   : > { %v1353_v24 = vld [vmem:[%s1925_s1 + $0x18] sm:$0xff]  ;;  %v1362_v25 = vld [vmem:[%s1925_s1 + $0x60] sm:$0xff]  ;;  %v1363_v29 = vld [vmem:[%s1925_s1 + $0x68] sm:$0xff]  ;;  %p1553_p12 = scmp.ne.s32.totalorder %s1551_s17, %s1552_s24  ;;  %p1558_p2 = scmp.lt.s32.totalorder %s1556_s11, %s1552_s24 }
  0x1d   : > { %773 = vmatpush.bf16.msra.mxu1 %v1347_v3  ;;  %1472 = vmatpush.bf16.msra.mxu2 %v1347_v3  ;;  %v1329_v26 = vld [vmem:[%s1744_s25 + $0x18] sm:$0xff]  ;;  %v1354_v28 = vld [vmem:[%s1925_s1 + $0x20] sm:$0xff]  ;;  %v1355_v32 = vld [vmem:[%s1925_s1 + $0x28] sm:$0xff] }
  0x1e   : > { %543 = vmatpush.bf16.msra.mxu0 %v1368_v4  ;;  %1467 = vmatpush.bf16.msra.mxu3 %v1368_v4  ;;  %v1337_v27 = vld [vmem:[%s1744_s25 + $0x58] sm:$0xff]  ;;  %v1330_v30 = vld [vmem:[%s1744_s25 + $0x20] sm:$0xff]  ;;  %v1364_v33 = vld [vmem:[%s1925_s1 + $0x70] sm:$0xff]  ;;  %p1554_p13 = pnand %p1553_p12, %p1688_p4  ;;  %p1559_p3 = por %p1558_p2, %p1557_p1 }
  0x1f   : > { %v1338_v31 = vld [vmem:[%s1744_s25 + $0x60] sm:$0xff]  ;;  %v1331_v34 = vld [vmem:[%s1744_s25 + $0x28] sm:$0xff]  ;;  %v1356_v36 = vld [vmem:[%s1925_s1 + $0x30] sm:$0xff] }
  0x20   : > { %v1339_v35 = vld [vmem:[%s1744_s25 + $0x68] sm:$0xff]  ;;  %v1365_v37 = vld [vmem:[%s1925_s1 + $0x78] sm:$0xff]  ;;  %v1332_v38 = vld [vmem:[%s1744_s25 + $0x30] sm:$0xff]  ;;  %p1555_p0 = pneg %p1554_p13 }
  0x21   : > { %774 = vmatpush.bf16.msra.mxu1 %v1346_v5  ;;  %1473 = vmatpush.bf16.msra.mxu2 %v1346_v5  ;;  %v1340_v39 = vld [vmem:[%s1744_s25 + $0x70] sm:$0xff]  ;;  %v1357_v40 = vld [vmem:[%s1925_s1 + $0x38] sm:$0xff]  ;;  %v1358_v43 = vld [vmem:[%s1925_s1 + $0x40] sm:$0xff] }
  0x22   : > { %544 = vmatpush.bf16.msra.mxu0 %v1367_v6  ;;  %1468 = vmatpush.bf16.msra.mxu3 %v1367_v6  ;;  %v1333_v41 = vld [vmem:[%s1744_s25 + $0x38] sm:$0xff]  ;;  %v1824_v49 = vld [vmem:[%s1928_s4] ss:$0 sm:$0xff]  ;;  %p1560_p5 = pnand %p1559_p3, %p1555_p0 }
  0x23   : > { %v1341_v42 = vld [vmem:[%s1744_s25 + $0x78] sm:$0xff]  ;;  %s271_s25 = sand.u32 1, %s1598_s19  }
  0x24   : > { %s1122_s8 = sshll.u32 %s271_s25, 7  ;;  %s993_s16 = scalar_lea.sflag [#allocation3], %s271_s25 }
  0x25   : > { %775 = vmatpush.bf16.msra.mxu1 %v1345_v7  ;;  %1474 = vmatpush.bf16.msra.mxu2 %v1345_v7  ;;  %s1835_s9 = scalar_lea.vmem [#allocation2], %s1122_s8 }
  0x26   : > { %545 = vmatpush.bf16.msra.mxu0 %v1366_v8  ;;  %1469 = vmatpush.bf16.msra.mxu3 %v1366_v8  ;;  %s1007_s21 = sshll.u32 %s1835_s9, 4  ;;  %s1008_s21 = int_to_ptr.vmem [resolvable:$true] %s1007_s21 }
  0x29   : > { %776 = vmatpush.bf16.msra.mxu1 %v1344_v9  ;;  %1475 = vmatpush.bf16.msra.mxu2 %v1344_v9 }
  0x2a   : > { %1207 = vmatmul.msk.bf16.vlgmr.msra.gmra.mxu0 %vm489_vm0, %v1350_v10  ;;  %1216 = vmatmul.msk.bf16.vlgmr.msra.gmra.mxu3 %vm489_vm0, %v1359_v11 }
  0x2d   : > { %777 = vmatpush.bf16.msra.mxu1 %v1343_v12  ;;  %1476 = vmatpush.bf16.msra.mxu2 %v1343_v12 }
  0x31   : > { %778 = vmatpush.bf16.msra.mxu1 %v1342_v13  ;;  %1477 = vmatpush.bf16.msra.mxu2 %v1342_v13 }
  0x34   : > { %779 = vmatmul.bf16.vlgmr.msra.gmra.mxu1 %v1326_v14  ;;  %819 = vmatmul.bf16.vlgmr.msra.gmra.mxu2 %v1334_v15 }
  0x3a   : > { %1208 = vmatmul.msk.bf16.gmra.mxu0 %vm489_vm0, %v1351_v16  ;;  %1217 = vmatmul.msk.bf16.gmra.mxu3 %vm489_vm0, %v1360_v17 }
  0x44   : > { %784 = vmatmul.bf16.gmra.mxu1 %v1327_v18  ;;  %824 = vmatmul.bf16.gmra.mxu2 %v1335_v19 }
  0x4a   : > { %1209 = vmatmul.msk.bf16.gmra.mxu0 %vm489_vm0, %v1352_v20  ;;  %1218 = vmatmul.msk.bf16.gmra.mxu3 %vm489_vm0, %v1361_v21 }
  0x54   : > { %789 = vmatmul.bf16.gmra.mxu1 %v1328_v22  ;;  %829 = vmatmul.bf16.gmra.mxu2 %v1336_v23 }
  0x5a   : > { %1210 = vmatmul.msk.bf16.gmra.mxu0 %vm489_vm0, %v1353_v24  ;;  %1219 = vmatmul.msk.bf16.gmra.mxu3 %vm489_vm0, %v1362_v25 }
  0x64   : > { %794 = vmatmul.bf16.gmra.mxu1 %v1329_v26  ;;  %834 = vmatmul.bf16.gmra.mxu2 %v1337_v27 }
  0x6a   : > { %1211 = vmatmul.msk.bf16.gmra.mxu0 %vm489_vm0, %v1354_v28  ;;  %1220 = vmatmul.msk.bf16.gmra.mxu3 %vm489_vm0, %v1363_v29 }
  0x74   : > { %799 = vmatmul.bf16.gmra.mxu1 %v1330_v30  ;;  %839 = vmatmul.bf16.gmra.mxu2 %v1338_v31 }
  0x7a   : > { %1212 = vmatmul.msk.bf16.gmra.mxu0 %vm489_vm0, %v1355_v32  ;;  %1221 = vmatmul.msk.bf16.gmra.mxu3 %vm489_vm0, %v1364_v33 }
  0x84   : > { %804 = vmatmul.bf16.gmra.mxu1 %v1331_v34  ;;  %844 = vmatmul.bf16.gmra.mxu2 %v1339_v35 }
  0x8a   : > { %1213 = vmatmul.msk.bf16.gmra.mxu0 %vm489_vm0, %v1356_v36  ;;  %1222 = vmatmul.msk.bf16.gmra.mxu3 %vm489_vm0, %v1365_v37 }
  0x94   : > { %809 = vmatmul.bf16.gmra.mxu1 %v1332_v38  ;;  %849 = vmatmul.bf16.gmra.mxu2 %v1340_v39 }
  0x9a   : > { %1214 = vmatmul.msk.bf16.gmra.mxu0 %vm489_vm0, %v1357_v40 }
  0xa4   : > { %814 = vmatmul.bf16.gmra.mxu1 %v1333_v41  ;;  %854 = vmatmul.bf16.gmra.mxu2 %v1341_v42 }
  0xa7   : > { %v547_v44 = vpop.f32.mrf.mxu0 }
  0xaa   : > { %1215 = vmatmul.msk.bf16.gmra.mxu0 %vm489_vm0, %v1358_v43 }
  0xad   : > { %v592_v45 = vpop.f32.mrf.mxu3 }
  0xaf   : > { %v549_v46 = vpop.f32.mrf.mxu0 }
  0xb1   : > { %v780_v47 = vpop.f32.mrf.mxu1 }
  0xb2   : > { %v781_v48 = vadd.f32 %v780_v47, %v547_v44 }
  0xb4   : > { %v864_v54 = vadd.f32 %v1824_v49, %v781_v48 }
  0xb5   : > { %v594_v50 = vpop.f32.mrf.mxu3 }
  0xb6   : > { %v896_v57 = vmax.f32 %v864_v54, 0.0 }
  0xb7   : > { %v552_v51 = vpop.f32.mrf.mxu0  ;;  %v1826_v52 = vpop.f32.mrf.mxu2 }
  0xb9   : > { %v782_v53 = vpop.f32.mrf.mxu1 }
  0xba   : > { %v783_v55 = vadd.f32 %v782_v53, %v549_v46 }
  0xbc   : > { %v865_v56 = vadd.f32 %v1824_v49, %v783_v55 }
  0xbd   : > { %v597_v62 = vpop.f32.mrf.mxu3 }
  0xbe   : > { %v897_v58 = vmax.f32 %v865_v56, 0.0 }
  0xbf   : > { %v554_v59 = vpop.f32.mrf.mxu0  ;;  %v1833_v60 = vpop.f32.mrf.mxu2 }
  0xc0   : > { %v1374_v61 = vpack.c.bf16 %v897_v58, %v896_v57 }
  0xc1   : > { %v785_v63 = vpop.f32.mrf.mxu1 }
  0xc2   : > { %1375 = vst [vmem:[%s1835_s9] sm:$0xff] %v1374_v61   ;;  %v786_v0 = vadd.f32 %v785_v63, %v552_v51 }
  0xc4   : > { %v866_v4 = vadd.f32 %v1824_v49, %v786_v0 }
  0xc5   : > { %v599_v6 = vpop.f32.mrf.mxu3 }
  0xc6   : > { %v898_v9 = vmax.f32 %v866_v4, 0.0 }
  0xc7   : > { %v557_v1 = vpop.f32.mrf.mxu0  ;;  %v825_v2 = vpop.f32.mrf.mxu2 }
  0xc8   : > { %v826_v7 = vadd.f32 %v825_v2, %v592_v45 }
  0xc9   : > { %v787_v3 = vpop.f32.mrf.mxu1 }
  0xca   : > { %v788_v5 = vadd.f32 %v787_v3, %v554_v59  ;;  %v882_v13 = vadd.f32 %v1824_v49, %v826_v7 }
  0xcc   : > { %v867_v8 = vadd.f32 %v1824_v49, %v788_v5  ;;  %v914_v18 = vmax.f32 %v882_v13, 0.0 }
  0xcd   : > { %v602_v20 = vpop.f32.mrf.mxu3 }
  0xce   : > { %v899_v10 = vmax.f32 %v867_v8, 0.0 }
  0xcf   : > { %v559_v11 = vpop.f32.mrf.mxu0  ;;  %v827_v12 = vpop.f32.mrf.mxu2 }
  0xd0   : > { %v1379_v14 = vpack.c.bf16 %v899_v10, %v898_v9  ;;  %v828_v15 = vadd.f32 %v827_v12, %v594_v50 }
  0xd1   : > { %v790_v16 = vpop.f32.mrf.mxu1 }
  0xd2   : > { %1451 = vst [vmem:[%s1835_s9 + $0x8] sm:$0xff] %v1379_v14   ;;  %v883_v17 = vadd.f32 %v1824_v49, %v828_v15  ;;  %v791_v22 = vadd.f32 %v790_v16, %v557_v1 }
  0xd4   : > { %v915_v19 = vmax.f32 %v883_v17, 0.0  ;;  %v868_v26 = vadd.f32 %v1824_v49, %v791_v22 }
  0xd5   : > { %v604_v32 = vpop.f32.mrf.mxu3 }
  0xd6   : > { %v1419_v21 = vpack.c.bf16 %v915_v19, %v914_v18  ;;  %v900_v30 = vmax.f32 %v868_v26, 0.0 }
  0xd7   : > { %v562_v23 = vpop.f32.mrf.mxu0  ;;  %v830_v24 = vpop.f32.mrf.mxu2 }
  0xd8   : > { %1459 = vst [vmem:[%s1835_s9 + $0x48] sm:$0xff] %v1419_v21   ;;  %v831_v28 = vadd.f32 %v830_v24, %v597_v62 }
  0xd9   : > { %v792_v25 = vpop.f32.mrf.mxu1 }
  0xda   : > { %v793_v27 = vadd.f32 %v792_v25, %v559_v11  ;;  %v884_v35 = vadd.f32 %v1824_v49, %v831_v28 }
  0xdc   : > { %v869_v29 = vadd.f32 %v1824_v49, %v793_v27  ;;  %v916_v40 = vmax.f32 %v884_v35, 0.0 }
  0xdd   : > { %v607_v46 = vpop.f32.mrf.mxu3 }
  0xde   : > { %v901_v31 = vmax.f32 %v869_v29, 0.0 }
  0xdf   : > { %v564_v33 = vpop.f32.mrf.mxu0  ;;  %v832_v34 = vpop.f32.mrf.mxu2 }
  0xe0   : > { %v1384_v36 = vpack.c.bf16 %v901_v31, %v900_v30  ;;  %v833_v37 = vadd.f32 %v832_v34, %v599_v6 }
  0xe1   : > { %v795_v38 = vpop.f32.mrf.mxu1 }
  0xe2   : > { %1452 = vst [vmem:[%s1835_s9 + $0x10] sm:$0xff] %v1384_v36   ;;  %v885_v39 = vadd.f32 %v1824_v49, %v833_v37  ;;  %v796_v43 = vadd.f32 %v795_v38, %v562_v23 }
  0xe4   : > { %v917_v41 = vmax.f32 %v885_v39, 0.0  ;;  %v870_v48 = vadd.f32 %v1824_v49, %v796_v43 }
  0xe5   : > { %v609_v0 = vpop.f32.mrf.mxu3 }
  0xe6   : > { %v1424_v42 = vpack.c.bf16 %v917_v41, %v916_v40  ;;  %v902_v54 = vmax.f32 %v870_v48, 0.0 }
  0xe7   : > { %v567_v44 = vpop.f32.mrf.mxu0  ;;  %v835_v45 = vpop.f32.mrf.mxu2 }
  0xe8   : > { %1460 = vst [vmem:[%s1835_s9 + $0x50] sm:$0xff] %v1424_v42   ;;  %v836_v51 = vadd.f32 %v835_v45, %v602_v20 }
  0xe9   : > { %v797_v47 = vpop.f32.mrf.mxu1 }
  0xea   : > { %v798_v50 = vadd.f32 %v797_v47, %v564_v33  ;;  %v886_v58 = vadd.f32 %v1824_v49, %v836_v51 }
  0xec   : > { %v871_v53 = vadd.f32 %v1824_v49, %v798_v50  ;;  %v918_v1 = vmax.f32 %v886_v58, 0.0 }
  0xed   : > { %v612_v12 = vpop.f32.mrf.mxu3 }
  0xee   : > { %v903_v55 = vmax.f32 %v871_v53, 0.0 }
  0xef   : > { %v569_v56 = vpop.f32.mrf.mxu0  ;;  %v837_v57 = vpop.f32.mrf.mxu2 }
  0xf0   : > { %v1389_v59 = vpack.c.bf16 %v903_v55, %v902_v54  ;;  %v838_v61 = vadd.f32 %v837_v57, %v604_v32 }
  0xf1   : > { %v800_v62 = vpop.f32.mrf.mxu1 }
  0xf2   : > { %1453 = vst [vmem:[%s1835_s9 + $0x18] sm:$0xff] %v1389_v59   ;;  %v887_v63 = vadd.f32 %v1824_v49, %v838_v61  ;;  %v801_v4 = vadd.f32 %v800_v62, %v567_v44 }
  0xf4   : > { %v919_v2 = vmax.f32 %v887_v63, 0.0  ;;  %v872_v8 = vadd.f32 %v1824_v49, %v801_v4 }
  0xf5   : > { %v614_v26 = vpop.f32.mrf.mxu3 }
  0xf6   : > { %v1429_v3 = vpack.c.bf16 %v919_v2, %v918_v1  ;;  %v904_v13 = vmax.f32 %v872_v8, 0.0 }
  0xf7   : > { %v572_v5 = vpop.f32.mrf.mxu0  ;;  %v840_v6 = vpop.f32.mrf.mxu2 }
  0xf8   : > { %1461 = vst [vmem:[%s1835_s9 + $0x58] sm:$0xff] %v1429_v3   ;;  %v841_v10 = vadd.f32 %v840_v6, %v607_v46 }
  0xf9   : > { %v802_v7 = vpop.f32.mrf.mxu1 }
  0xfa   : > { %v803_v9 = vadd.f32 %v802_v7, %v569_v56  ;;  %v888_v17 = vadd.f32 %v1824_v49, %v841_v10 }
  0xfc   : > { %v873_v11 = vadd.f32 %v1824_v49, %v803_v9  ;;  %v920_v22 = vmax.f32 %v888_v17, 0.0 }
  0xfd   : > { %v617_v40 = vpop.f32.mrf.mxu3 }
  0xfe   : > { %v905_v14 = vmax.f32 %v873_v11, 0.0 }
  0xff   : > { %v574_v15 = vpop.f32.mrf.mxu0  ;;  %v842_v16 = vpop.f32.mrf.mxu2 }
 0x100   : > { %v1394_v18 = vpack.c.bf16 %v905_v14, %v904_v13  ;;  %v843_v19 = vadd.f32 %v842_v16, %v609_v0 }
 0x101   : > { %v805_v20 = vpop.f32.mrf.mxu1 }
 0x102   : > { %1454 = vst [vmem:[%s1835_s9 + $0x20] sm:$0xff] %v1394_v18   ;;  %v889_v21 = vadd.f32 %v1824_v49, %v843_v19  ;;  %v806_v25 = vadd.f32 %v805_v20, %v572_v5 }
 0x104   : > { %v921_v23 = vmax.f32 %v889_v21, 0.0  ;;  %v874_v30 = vadd.f32 %v1824_v49, %v806_v25 }
 0x105   : > { %v619_v54 = vpop.f32.mrf.mxu3 }
 0x106   : > { %v1434_v24 = vpack.c.bf16 %v921_v23, %v920_v22  ;;  %v906_v34 = vmax.f32 %v874_v30, 0.0 }
 0x107   : > { %v577_v27 = vpop.f32.mrf.mxu0  ;;  %v845_v28 = vpop.f32.mrf.mxu2 }
 0x108   : > { %1462 = vst [vmem:[%s1835_s9 + $0x60] sm:$0xff] %v1434_v24   ;;  %v846_v32 = vadd.f32 %v845_v28, %v612_v12 }
 0x109   : > { %v807_v29 = vpop.f32.mrf.mxu1 }
 0x10a   : > { %v808_v31 = vadd.f32 %v807_v29, %v574_v15  ;;  %v890_v38 = vadd.f32 %v1824_v49, %v846_v32 }
 0x10c   : > { %v875_v33 = vadd.f32 %v1824_v49, %v808_v31  ;;  %v922_v44 = vmax.f32 %v890_v38, 0.0 }
 0x10d   : > { %v622_v5 = vpop.f32.mrf.mxu3 }
 0x10e   : > { %v907_v35 = vmax.f32 %v875_v33, 0.0 }
 0x10f   : > { %v579_v36 = vpop.f32.mrf.mxu0  ;;  %v847_v37 = vpop.f32.mrf.mxu2 }
 0x110   : > { %v1399_v39 = vpack.c.bf16 %v907_v35, %v906_v34  ;;  %v848_v41 = vadd.f32 %v847_v37, %v614_v26 }
 0x111   : > { %v810_v42 = vpop.f32.mrf.mxu1 }
 0x112   : > { %1455 = vst [vmem:[%s1835_s9 + $0x28] sm:$0xff] %v1399_v39   ;;  %v891_v43 = vadd.f32 %v1824_v49, %v848_v41  ;;  %v811_v47 = vadd.f32 %v810_v42, %v577_v27 }
 0x114   : > { %v923_v45 = vmax.f32 %v891_v43, 0.0  ;;  %v876_v53 = vadd.f32 %v1824_v49, %v811_v47 }
 0x115   : > { %v624_v18 = vpop.f32.mrf.mxu3 }
 0x116   : > { %v1439_v46 = vpack.c.bf16 %v923_v45, %v922_v44  ;;  %v908_v58 = vmax.f32 %v876_v53, 0.0 }
 0x117   : > { %v582_v48 = vpop.f32.mrf.mxu0  ;;  %v850_v50 = vpop.f32.mrf.mxu2 }
 0x118   : > { %1463 = vst [vmem:[%s1835_s9 + $0x68] sm:$0xff] %v1439_v46   ;;  %v851_v56 = vadd.f32 %v850_v50, %v617_v40 }
 0x119   : > { %v812_v51 = vpop.f32.mrf.mxu1 }
 0x11a   : > { %v813_v55 = vadd.f32 %v812_v51, %v579_v36  ;;  %v892_v63 = vadd.f32 %v1824_v49, %v851_v56 }
 0x11c   : > { %v877_v57 = vadd.f32 %v1824_v49, %v813_v55  ;;  %v924_v4 = vmax.f32 %v892_v63, 0.0 }
 0x11e   : > { %v909_v59 = vmax.f32 %v877_v57, 0.0 }
 0x11f   : > { %v584_v61 = vpop.f32.mrf.mxu0  ;;  %v852_v62 = vpop.f32.mrf.mxu2 }
 0x120   : > { %v1404_v0 = vpack.c.bf16 %v909_v59, %v908_v58  ;;  %v853_v1 = vadd.f32 %v852_v62, %v619_v54 }
 0x121   : > { %v815_v2 = vpop.f32.mrf.mxu1 }
 0x122   : > { %1456 = vst [vmem:[%s1835_s9 + $0x30] sm:$0xff] %v1404_v0   ;;  %v893_v3 = vadd.f32 %v1824_v49, %v853_v1  ;;  %v816_v8 = vadd.f32 %v815_v2, %v582_v48 }
 0x124   : > { %v925_v6 = vmax.f32 %v893_v3, 0.0  ;;  %v878_v12 = vadd.f32 %v1824_v49, %v816_v8 }
 0x126   : > { %v1444_v7 = vpack.c.bf16 %v925_v6, %v924_v4  ;;  %v910_v17 = vmax.f32 %v878_v12, 0.0 }
 0x127   : > { %v587_v9 = vpop.f32.mrf.mxu0  ;;  %v855_v10 = vpop.f32.mrf.mxu2 }
 0x128   : > { %1464 = vst [vmem:[%s1835_s9 + $0x70] sm:$0xff] %v1444_v7   ;;  %v821_v14 = vadd.f32 %v1826_v52, %v587_v9  ;;  %v856_v15 = vadd.f32 %v855_v10, %v622_v5 }
 0x129   : > { %v817_v11 = vpop.f32.mrf.mxu1 }
 0x12a   : > { %v818_v13 = vadd.f32 %v817_v11, %v584_v61  ;;  %v880_v20 = vadd.f32 %v1824_v49, %v821_v14  ;;  %v894_v23 = vadd.f32 %v1824_v49, %v856_v15 }
 0x12c   : > { %v879_v16 = vadd.f32 %v1824_v49, %v818_v13  ;;  %v912_v28 = vmax.f32 %v880_v20, 0.0  ;;  %v926_v29 = vmax.f32 %v894_v23, 0.0 }
 0x12e   : > { %v911_v19 = vmax.f32 %v879_v16, 0.0 }
 0x12f   : > { %v589_v21 = vpop.f32.mrf.mxu0  ;;  %v857_v22 = vpop.f32.mrf.mxu2 }
 0x130   : > { %v1409_v24 = vpack.c.bf16 %v911_v19, %v910_v17  ;;  %v823_v25 = vadd.f32 %v1833_v60, %v589_v21  ;;  %v858_v26 = vadd.f32 %v857_v22, %v624_v18 }
 0x132   : > { %1457 = vst [vmem:[%s1835_s9 + $0x38] sm:$0xff] %v1409_v24   ;;  %v881_v52 = vadd.f32 %v1824_v49, %v823_v25  ;;  %v895_v27 = vadd.f32 %v1824_v49, %v858_v26 }
 0x134   : > { %v913_v30 = vmax.f32 %v881_v52, 0.0  ;;  %v927_v60 = vmax.f32 %v895_v27, 0.0 }
 0x136   : > { %v1414_v31 = vpack.c.bf16 %v913_v30, %v912_v28  ;;  %v1449_v32 = vpack.c.bf16 %v927_v60, %v926_v29 }
 0x138   : > { %1458 = vst [vmem:[%s1835_s9 + $0x40] sm:$0xff] %v1414_v31  }
 0x139   : > { %1465 = vst [vmem:[%s1835_s9 + $0x78] sm:$0xff] %v1449_v32  }
 0x13a   : > { %1563 = shalt.err (!%p1560_p5)
}
 0x13b   : > { %s1616_s25 = smov 64   ;;  %s1617_s9 = smov 4  }
 0x13c   : > { %1478 = dma.vmem_to_hbm [thread:$0]  (%p1688_p4), %s1008_s21, 2048, %s1010_s15, %s993_s16, %s1616_s25, %s1616_s25, %s1617_s9  }
 0x13d PF: > { %p1484_p6 = scmp.ge.s32.totalorder %s1614_s23, 2  ;;  %s1024_s10 = sand.u32 1, %s1594_s18  }
 0x13e   : > { %s1025_s12 = scalar_lea.sflag [#allocation3], %s1024_s10 }
 0x13f   : > { %p1481_p7 = pnand %p1484_p6, %p1695_p8 }
 0x141   : > { %p1482_p9 = pneg %p1481_p7 }
 0x143   : > { %1589 = dma.done.wait (%p1482_p9), %s1025_s12, 2048  }
 0x144   : > { %1591 = vsyncadd (%p1482_p9), %s1025_s12, 4294965248  ;;  %s18_s23 = sadd.s32 1, %s1614_s23   ;;  %s1932_s18 = smov %s1598_s19 }
 0x145   : > { %p15_p10 = scmp.ge.s32.totalorder %s18_s23, 4   ;;  %s1933_s19 = smov %s1602_s20 }
 0x146   : > { %s1934_s20 = smov %s1701_s6  ;;  %s1935_s21 = smov %s1610_s22 }
 0x147   : > { %s1936_s22 = smov %s1938_s26  ;;  %17 = sbr.rel (!%p15_p10) target bundleno = 4 (0x4), region = 81 }
 0x14c   :  { %1031 = vsyncpa [#allocation3], 1 }
 0x14d   :  { %1033 = vsyncpa [#allocation3 + $0x1], 1 }

</bundles_post_ra>
